<compile_context>
chip_gen: v5e
topology: v5e:2x2
jax: 0.10.0
libtpu: 0.0.40
codegen_flags: <defaults>
</compile_context>

<pallas_src>
import jax
import jax.numpy as jnp
from jax import lax
from jax.experimental import pallas as pl
from jax.experimental.pallas import tpu as pltpu
import numpy as np


def add_padding(hd: jax.Array, mask: jax.Array, *, group: int = 8) -> jax.Array:
    """Pallas equivalent of OnnxAddpadding.forward."""
    B, S = mask.shape
    _, T, H = hd.shape
    hd2d = jnp.reshape(hd, (T, H))          # metadata-only reshape, no HBM copy

    # Static window length: every batch row's valid tokens (seq_len[i] <= min(S, T))
    # fit inside a W-row window, so a fixed-size DMA always suffices.
    W = min(S, T)

    # Scalar (SMEM-prefetched) schedule: valid length, clamped window start
    # (keeps the window inside [0, T) without padding hd), and the shift that
    # the clamp introduces (0 for all but the tail rows).
    seq_len = jnp.sum(mask.astype(jnp.int32), axis=-1).astype(jnp.int32)            # (B,)
    cum = jnp.concatenate(
        [jnp.zeros((1,), jnp.int32), jnp.cumsum(seq_len)[:-1].astype(jnp.int32)])   # (B,) exclusive
    start = jnp.minimum(cum, T - W).astype(jnp.int32)                               # (B,)
    delta = (cum - start).astype(jnp.int32)                                         # (B,), 0 <= delta <= W

    # Rows per grid step.  NOTE: for production-scale S*H, tile the S axis as
    # well so 2x(output block) + scratch stays inside the VMEM budget
    # (64 MiB physical on v7x); the shapes exercised here are tiny.
    G = max(1, min(group, B))
    num_groups = pl.cdiv(B, G)

    def kernel(seq_ref, start_ref, delta_ref, hd_ref, out_ref,
               buf_ref, fix_ref, in_sem, fix_sem):
        # seq/start/delta : SMEM scalar-prefetch refs, (B,) int32
        # hd_ref          : raw HBM ref, (T, H)
        # out_ref         : VMEM output block, (G, S, H)
        # buf_ref         : VMEM scratch, (G, 2*S, H) -- raw row windows
        # fix_ref         : VMEM scratch, (G, S, H)   -- shift-corrected windows
        # in_sem, fix_sem : DMA semaphores, (G,) and ()
        base = pl.program_id(0) * G

        # 1) Launch all G row-window DMAs so they are in flight together.
        #    Tail-group rows past B-1 are clamped to row B-1; their output
        #    block rows fall outside (B, S, H) and are clipped by Pallas.
        copies = []
        for g in range(G):
            row = jnp.minimum(base + g, B - 1)
            cp = pltpu.make_async_copy(
                hd_ref.at[pl.ds(start_ref[row], W), :],
                buf_ref.at[g, pl.ds(0, W), :],
                in_sem.at[g])
            cp.start()
            copies.append(cp)

        # 2) Consume each row: wait its DMA, undo the clamp shift (tail rows
        #    only), zero padded positions, store the lane-dense block row.
        for g in range(G):
            row = jnp.minimum(base + g, B - 1)
            sl = seq_ref[row]          # valid tokens for this batch row
            dlt = delta_ref[row]       # window shift caused by the clamp
            copies[g].wait()

            # The clamped window begins `dlt` rows before this batch row's
            # tokens.  Realign with a small VMEM->VMEM copy (DMA offsets may
            # be dynamic/unaligned).  Rows read beyond the W filled rows of
            # buf only land in positions j >= sl, which are zeroed below.
            @pl.when(dlt > 0)
            def _():
                fix_cp = pltpu.make_async_copy(
                    buf_ref.at[g, pl.ds(dlt, S), :], fix_ref.at[g], fix_sem)
                fix_cp.start()
                fix_cp.wait()

            rows = jnp.where(dlt > 0, fix_ref[g], buf_ref[g, 0:S, :])
            j = lax.broadcasted_iota(jnp.int32, (S, 1), 0)
            out_ref[g] = jnp.where(j < sl, rows, jnp.zeros_like(rows))

    return pl.pallas_call(
        kernel,
        out_shape=jax.ShapeDtypeStruct((B, S, H), hd.dtype),
        grid_spec=pltpu.PrefetchScalarGridSpec(
            num_scalar_prefetch=3,
            grid=(num_groups,),
            in_specs=[
                # packed hd stays in HBM; only the needed row windows are DMA'd.
                pl.BlockSpec(memory_space=pl.ANY),
            ],
            out_specs=pl.BlockSpec((G, S, H),
                                   lambda i, seq_r, start_r, delta_r: (i, 0, 0)),
            scratch_shapes=[
                pltpu.VMEM((G, 2 * S, H), hd.dtype),
                pltpu.VMEM((G, S, H), hd.dtype),
                pltpu.SemaphoreType.DMA((G,)),
                pltpu.SemaphoreType.DMA(()),
            ],
        ),
        compiler_params=pltpu.CompilerParams(
            # Group axis carries no state -> megacore-shardable on v7x.
            dimension_semantics=("parallel",),
            # Explicit scoped-VMEM budget (safe on v5e/v6e/v7x; tiny here).
            vmem_limit_bytes=32 * 1024 * 1024,
        ),
    )(seq_len, start, delta, hd2d)


def _reference_add_padding(hd, mask):
    """Pure-numpy reference mirroring the PyTorch loop."""
    hd = np.asarray(hd)
    mask = np.asarray(mask)
    B, S = mask.shape
    H = hd.shape[-1]
    out = np.zeros((B, S, H), dtype=hd.dtype)
    pre = 0
    for i in range(B):
        sl = int(mask[i].sum())
        out[i, :sl] = hd[0, pre:pre + sl]
        pre += sl
    return out


if __name__ == "__main__":
    key = jax.random.PRNGKey(0)

    # Case 1: B=2, S=8, H=128 (the module's head_size), single group step.
    # Case 2: odd B with a ragged tail group; exercises row clamping, partial
    #         output blocks and the clamped/shifted window (delta > 0) path.
    cases = [
        (np.array([5, 3], dtype=np.int32), 8, 128, 8),
        (np.array([5, 3, 8, 1, 6], dtype=np.int32), 8, 128, 2),
    ]
    for seq_lens, S, H, group in cases:
        B = seq_lens.shape[0]
        T = int(seq_lens.sum())

        mask_np = np.zeros((B, S), dtype=np.int32)
        for i, sl in enumerate(seq_lens):
            mask_np[i, :sl] = 1
        mask = jnp.asarray(mask_np)

        key, sub = jax.random.split(key)
        hd = jax.random.normal(sub, (1, T, H), dtype=jnp.float32)

        out = jax.block_until_ready(add_padding(hd, mask, group=group))
        ref = _reference_add_padding(np.asarray(hd), mask_np)
        np.testing.assert_allclose(np.asarray(out), ref, rtol=1e-6, atol=1e-6)

    print("KERNEL_OK")
</pallas_src>

<mosaic_0001>
module attributes {stable_mosaic.version = 11 : i64} {
  func.func @kernel(%arg0: i32, %arg1: memref<2xi32, #tpu.memory_space<smem>>, %arg2: memref<2xi32, #tpu.memory_space<smem>>, %arg3: memref<2xi32, #tpu.memory_space<smem>>, %arg4: memref<8x128xf32, #tpu.memory_space<any>>, %arg5: memref<2x8x128xf32, #tpu.memory_space<vmem>>, %arg6: memref<2x16x128xf32, #tpu.memory_space<vmem>>, %arg7: memref<2x8x128xf32, #tpu.memory_space<vmem>>, %arg8: memref<2x!tpu.dma_semaphore, #tpu.memory_space<semaphore_mem>>, %arg9: memref<!tpu.dma_semaphore, #tpu.memory_space<semaphore_mem>>) attributes {dimension_semantics = [#tpu.dimension_semantics<parallel>], iteration_bounds = array<i64: 1>, scalar_prefetch = 3 : i64, scratch_operands = 4 : i64, tpu.core_type = #tpu.core_type<tc>, window_params = [{}, {transform_indices = @transform_1, window_bounds = array<i64: 2, 8, 128>}]} {
    %c2_i32 = arith.constant 2 : i32
    %0 = arith.muli %arg0, %c2_i32 : i32
    %c0_i32 = arith.constant 0 : i32
    %1 = arith.addi %0, %c0_i32 : i32
    %c1_i32 = arith.constant 1 : i32
    %2 = arith.minsi %1, %c1_i32 : i32
    %3 = arith.index_cast %2 : i32 to index
    %4 = memref.load %arg2[%3] : memref<2xi32, #tpu.memory_space<smem>>
    %c0_i32_0 = arith.constant 0 : i32
    %c0_i32_1 = arith.constant 0 : i32
    %c0_i32_2 = arith.constant 0 : i32
    %5 = tpu.memref_slice %arg4[%4, %c0_i32_2] : memref<8x128xf32, #tpu.memory_space<any>> -> memref<8x128xf32, #tpu.memory_space<any>>
    %c0_i32_3 = arith.constant 0 : i32
    %c0_i32_4 = arith.constant 0 : i32
    %6 = tpu.memref_slice %arg6[%c0_i32_0, %c0_i32_3, %c0_i32_4] : memref<2x16x128xf32, #tpu.memory_space<vmem>> -> memref<1x8x128xf32, #tpu.memory_space<vmem>>
    %7 = tpu.memref_squeeze %6 : memref<1x8x128xf32, #tpu.memory_space<vmem>> -> memref<8x128xf32, #tpu.memory_space<vmem>>
    %8 = tpu.memref_slice %arg8[%c0_i32_1] : memref<2x!tpu.dma_semaphore, #tpu.memory_space<semaphore_mem>> -> memref<1x!tpu.dma_semaphore, #tpu.memory_space<semaphore_mem>>
    %9 = tpu.memref_squeeze %8 : memref<1x!tpu.dma_semaphore, #tpu.memory_space<semaphore_mem>> -> memref<!tpu.dma_semaphore, #tpu.memory_space<semaphore_mem>>
    tpu.enqueue_dma source(%5 : memref<8x128xf32, #tpu.memory_space<any>>) target(%7 : memref<8x128xf32, #tpu.memory_space<vmem>>) target_semaphore(%9 : memref<!tpu.dma_semaphore, #tpu.memory_space<semaphore_mem>>)
    %c1_i32_5 = arith.constant 1 : i32
    %10 = arith.addi %0, %c1_i32_5 : i32
    %c1_i32_6 = arith.constant 1 : i32
    %11 = arith.minsi %10, %c1_i32_6 : i32
    %12 = arith.index_cast %11 : i32 to index
    %13 = memref.load %arg2[%12] : memref<2xi32, #tpu.memory_space<smem>>
    %c1_i32_7 = arith.constant 1 : i32
    %c1_i32_8 = arith.constant 1 : i32
    %c0_i32_9 = arith.constant 0 : i32
    %14 = tpu.memref_slice %arg4[%13, %c0_i32_9] : memref<8x128xf32, #tpu.memory_space<any>> -> memref<8x128xf32, #tpu.memory_space<any>>
    %c0_i32_10 = arith.constant 0 : i32
    %c0_i32_11 = arith.constant 0 : i32
    %15 = tpu.memref_slice %arg6[%c1_i32_7, %c0_i32_10, %c0_i32_11] : memref<2x16x128xf32, #tpu.memory_space<vmem>> -> memref<1x8x128xf32, #tpu.memory_space<vmem>>
    %16 = tpu.memref_squeeze %15 : memref<1x8x128xf32, #tpu.memory_space<vmem>> -> memref<8x128xf32, #tpu.memory_space<vmem>>
    %17 = tpu.memref_slice %arg8[%c1_i32_8] : memref<2x!tpu.dma_semaphore, #tpu.memory_space<semaphore_mem>> -> memref<1x!tpu.dma_semaphore, #tpu.memory_space<semaphore_mem>>
    %18 = tpu.memref_squeeze %17 : memref<1x!tpu.dma_semaphore, #tpu.memory_space<semaphore_mem>> -> memref<!tpu.dma_semaphore, #tpu.memory_space<semaphore_mem>>
    tpu.enqueue_dma source(%14 : memref<8x128xf32, #tpu.memory_space<any>>) target(%16 : memref<8x128xf32, #tpu.memory_space<vmem>>) target_semaphore(%18 : memref<!tpu.dma_semaphore, #tpu.memory_space<semaphore_mem>>)
    %c0_i32_12 = arith.constant 0 : i32
    %19 = arith.addi %0, %c0_i32_12 : i32
    %c1_i32_13 = arith.constant 1 : i32
    %20 = arith.minsi %19, %c1_i32_13 : i32
    %21 = arith.index_cast %20 : i32 to index
    %22 = memref.load %arg1[%21] : memref<2xi32, #tpu.memory_space<smem>>
    %23 = arith.index_cast %20 : i32 to index
    %24 = memref.load %arg3[%23] : memref<2xi32, #tpu.memory_space<smem>>
    %c0_i32_14 = arith.constant 0 : i32
    %c0_i32_15 = arith.constant 0 : i32
    %c0_i32_16 = arith.constant 0 : i32
    %25 = tpu.memref_slice %arg4[%4, %c0_i32_16] : memref<8x128xf32, #tpu.memory_space<any>> -> memref<8x128xf32, #tpu.memory_space<any>>
    %c0_i32_17 = arith.constant 0 : i32
    %c0_i32_18 = arith.constant 0 : i32
    %26 = tpu.memref_slice %arg6[%c0_i32_14, %c0_i32_17, %c0_i32_18] : memref<2x16x128xf32, #tpu.memory_space<vmem>> -> memref<1x8x128xf32, #tpu.memory_space<vmem>>
    %27 = tpu.memref_squeeze %26 : memref<1x8x128xf32, #tpu.memory_space<vmem>> -> memref<8x128xf32, #tpu.memory_space<vmem>>
    %28 = tpu.memref_slice %arg8[%c0_i32_15] : memref<2x!tpu.dma_semaphore, #tpu.memory_space<semaphore_mem>> -> memref<1x!tpu.dma_semaphore, #tpu.memory_space<semaphore_mem>>
    %29 = tpu.memref_squeeze %28 : memref<1x!tpu.dma_semaphore, #tpu.memory_space<semaphore_mem>> -> memref<!tpu.dma_semaphore, #tpu.memory_space<semaphore_mem>>
    tpu.wait_dma2 semaphore(%29 : memref<!tpu.dma_semaphore, #tpu.memory_space<semaphore_mem>>) src(%25 : memref<8x128xf32, #tpu.memory_space<any>>) dst(%27 : memref<8x128xf32, #tpu.memory_space<vmem>>)
    %c0_i32_19 = arith.constant 0 : i32
    %30 = arith.cmpi sgt, %24, %c0_i32_19 : i32
    %31 = arith.extui %30 : i1 to i32
    %c0_i32_20 = arith.constant 0 : i32
    %32 = arith.cmpi ne, %31, %c0_i32_20 : i32
    scf.if %32 {
      %c0_i32_49 = arith.constant 0 : i32
      %c0_i32_50 = arith.constant 0 : i32
      %c0_i32_51 = arith.constant 0 : i32
      %79 = tpu.memref_slice %arg6[%c0_i32_49, %24, %c0_i32_51] : memref<2x16x128xf32, #tpu.memory_space<vmem>> -> memref<1x8x128xf32, #tpu.memory_space<vmem>>
      %80 = tpu.memref_squeeze %79 : memref<1x8x128xf32, #tpu.memory_space<vmem>> -> memref<8x128xf32, #tpu.memory_space<vmem>>
      %c0_i32_52 = arith.constant 0 : i32
      %c0_i32_53 = arith.constant 0 : i32
      %81 = tpu.memref_slice %arg7[%c0_i32_50, %c0_i32_52, %c0_i32_53] : memref<2x8x128xf32, #tpu.memory_space<vmem>> -> memref<1x8x128xf32, #tpu.memory_space<vmem>>
      %82 = tpu.memref_squeeze %81 : memref<1x8x128xf32, #tpu.memory_space<vmem>> -> memref<8x128xf32, #tpu.memory_space<vmem>>
      tpu.enqueue_dma source(%80 : memref<8x128xf32, #tpu.memory_space<vmem>>) target(%82 : memref<8x128xf32, #tpu.memory_space<vmem>>) target_semaphore(%arg9 : memref<!tpu.dma_semaphore, #tpu.memory_space<semaphore_mem>>)
      %c0_i32_54 = arith.constant 0 : i32
      %c0_i32_55 = arith.constant 0 : i32
      %c0_i32_56 = arith.constant 0 : i32
      %83 = tpu.memref_slice %arg6[%c0_i32_54, %24, %c0_i32_56] : memref<2x16x128xf32, #tpu.memory_space<vmem>> -> memref<1x8x128xf32, #tpu.memory_space<vmem>>
      %84 = tpu.memref_squeeze %83 : memref<1x8x128xf32, #tpu.memory_space<vmem>> -> memref<8x128xf32, #tpu.memory_space<vmem>>
      %c0_i32_57 = arith.constant 0 : i32
      %c0_i32_58 = arith.constant 0 : i32
      %85 = tpu.memref_slice %arg7[%c0_i32_55, %c0_i32_57, %c0_i32_58] : memref<2x8x128xf32, #tpu.memory_space<vmem>> -> memref<1x8x128xf32, #tpu.memory_space<vmem>>
      %86 = tpu.memref_squeeze %85 : memref<1x8x128xf32, #tpu.memory_space<vmem>> -> memref<8x128xf32, #tpu.memory_space<vmem>>
      tpu.wait_dma2 semaphore(%arg9 : memref<!tpu.dma_semaphore, #tpu.memory_space<semaphore_mem>>) src(%84 : memref<8x128xf32, #tpu.memory_space<vmem>>) dst(%86 : memref<8x128xf32, #tpu.memory_space<vmem>>)
    } else {
    }
    %c0_i32_21 = arith.constant 0 : i32
    %33 = arith.cmpi sgt, %24, %c0_i32_21 : i32
    %c0 = arith.constant 0 : index
    %c0_22 = arith.constant 0 : index
    %c0_23 = arith.constant 0 : index
    %34 = vector.load %arg7[%c0, %c0_22, %c0_23] : memref<2x8x128xf32, #tpu.memory_space<vmem>>, vector<1x8x128xf32>
    %35 = vector.shape_cast %34 : vector<1x8x128xf32> to vector<8x128xf32>
    %c0_24 = arith.constant 0 : index
    %c0_25 = arith.constant 0 : index
    %c0_26 = arith.constant 0 : index
    %36 = vector.load %arg6[%c0_24, %c0_25, %c0_26] : memref<2x16x128xf32, #tpu.memory_space<vmem>>, vector<1x8x128xf32>
    %37 = vector.shape_cast %36 : vector<1x8x128xf32> to vector<8x128xf32>
    %38 = arith.select %33, %35, %37 : vector<8x128xf32>
    %39 = tpu.iota {dimensions = array<i32: 0>} : vector<8x1xi32>
    %40 = vector.broadcast %22 : i32 to vector<8x1xi32>
    %41 = arith.cmpi slt, %39, %40 : vector<8x1xi32>
    %cst = arith.constant 0.000000e+00 : f32
    %42 = vector.broadcast %cst : f32 to vector<8x128xf32>
    %43 = vector.shape_cast %41 : vector<8x1xi1> to vector<8x1xi1>
    %44 = vector.broadcast %43 : vector<8x1xi1> to vector<8x128xi1>
    %45 = arith.select %44, %38, %42 : vector<8x128xi1>, vector<8x128xf32>
    %c0_27 = arith.constant 0 : index
    %c0_28 = arith.constant 0 : index
    %c0_29 = arith.constant 0 : index
    %46 = vector.load %arg5[%c0_27, %c0_28, %c0_29] : memref<2x8x128xf32, #tpu.memory_space<vmem>>, vector<1x8x128xf32>
    %47 = vector.shape_cast %46 : vector<1x8x128xf32> to vector<8x128xf32>
    %48 = vector.shape_cast %45 : vector<8x128xf32> to vector<1x8x128xf32>
    tpu.vector_store %arg5[%c0_27, %c0_28, %c0_29], %48 {strides = array<i32>} : memref<2x8x128xf32, #tpu.memory_space<vmem>>, vector<1x8x128xf32>,
    %c1_i32_30 = arith.constant 1 : i32
    %49 = arith.addi %0, %c1_i32_30 : i32
    %c1_i32_31 = arith.constant 1 : i32
    %50 = arith.minsi %49, %c1_i32_31 : i32
    %51 = arith.index_cast %50 : i32 to index
    %52 = memref.load %arg1[%51] : memref<2xi32, #tpu.memory_space<smem>>
    %53 = arith.index_cast %50 : i32 to index
    %54 = memref.load %arg3[%53] : memref<2xi32, #tpu.memory_space<smem>>
    %c1_i32_32 = arith.constant 1 : i32
    %c1_i32_33 = arith.constant 1 : i32
    %c0_i32_34 = arith.constant 0 : i32
    %55 = tpu.memref_slice %arg4[%13, %c0_i32_34] : memref<8x128xf32, #tpu.memory_space<any>> -> memref<8x128xf32, #tpu.memory_space<any>>
    %c0_i32_35 = arith.constant 0 : i32
    %c0_i32_36 = arith.constant 0 : i32
    %56 = tpu.memref_slice %arg6[%c1_i32_32, %c0_i32_35, %c0_i32_36] : memref<2x16x128xf32, #tpu.memory_space<vmem>> -> memref<1x8x128xf32, #tpu.memory_space<vmem>>
    %57 = tpu.memref_squeeze %56 : memref<1x8x128xf32, #tpu.memory_space<vmem>> -> memref<8x128xf32, #tpu.memory_space<vmem>>
    %58 = tpu.memref_slice %arg8[%c1_i32_33] : memref<2x!tpu.dma_semaphore, #tpu.memory_space<semaphore_mem>> -> memref<1x!tpu.dma_semaphore, #tpu.memory_space<semaphore_mem>>
    %59 = tpu.memref_squeeze %58 : memref<1x!tpu.dma_semaphore, #tpu.memory_space<semaphore_mem>> -> memref<!tpu.dma_semaphore, #tpu.memory_space<semaphore_mem>>
    tpu.wait_dma2 semaphore(%59 : memref<!tpu.dma_semaphore, #tpu.memory_space<semaphore_mem>>) src(%55 : memref<8x128xf32, #tpu.memory_space<any>>) dst(%57 : memref<8x128xf32, #tpu.memory_space<vmem>>)
    %c0_i32_37 = arith.constant 0 : i32
    %60 = arith.cmpi sgt, %54, %c0_i32_37 : i32
    %61 = arith.extui %60 : i1 to i32
    %c0_i32_38 = arith.constant 0 : i32
    %62 = arith.cmpi ne, %61, %c0_i32_38 : i32
    scf.if %62 {
      %c1_i32_49 = arith.constant 1 : i32
      %c1_i32_50 = arith.constant 1 : i32
      %c0_i32_51 = arith.constant 0 : i32
      %79 = tpu.memref_slice %arg6[%c1_i32_49, %54, %c0_i32_51] : memref<2x16x128xf32, #tpu.memory_space<vmem>> -> memref<1x8x128xf32, #tpu.memory_space<vmem>>
      %80 = tpu.memref_squeeze %79 : memref<1x8x128xf32, #tpu.memory_space<vmem>> -> memref<8x128xf32, #tpu.memory_space<vmem>>
      %c0_i32_52 = arith.constant 0 : i32
      %c0_i32_53 = arith.constant 0 : i32
      %81 = tpu.memref_slice %arg7[%c1_i32_50, %c0_i32_52, %c0_i32_53] : memref<2x8x128xf32, #tpu.memory_space<vmem>> -> memref<1x8x128xf32, #tpu.memory_space<vmem>>
      %82 = tpu.memref_squeeze %81 : memref<1x8x128xf32, #tpu.memory_space<vmem>> -> memref<8x128xf32, #tpu.memory_space<vmem>>
      tpu.enqueue_dma source(%80 : memref<8x128xf32, #tpu.memory_space<vmem>>) target(%82 : memref<8x128xf32, #tpu.memory_space<vmem>>) target_semaphore(%arg9 : memref<!tpu.dma_semaphore, #tpu.memory_space<semaphore_mem>>)
      %c1_i32_54 = arith.constant 1 : i32
      %c1_i32_55 = arith.constant 1 : i32
      %c0_i32_56 = arith.constant 0 : i32
      %83 = tpu.memref_slice %arg6[%c1_i32_54, %54, %c0_i32_56] : memref<2x16x128xf32, #tpu.memory_space<vmem>> -> memref<1x8x128xf32, #tpu.memory_space<vmem>>
      %84 = tpu.memref_squeeze %83 : memref<1x8x128xf32, #tpu.memory_space<vmem>> -> memref<8x128xf32, #tpu.memory_space<vmem>>
      %c0_i32_57 = arith.constant 0 : i32
      %c0_i32_58 = arith.constant 0 : i32
      %85 = tpu.memref_slice %arg7[%c1_i32_55, %c0_i32_57, %c0_i32_58] : memref<2x8x128xf32, #tpu.memory_space<vmem>> -> memref<1x8x128xf32, #tpu.memory_space<vmem>>
      %86 = tpu.memref_squeeze %85 : memref<1x8x128xf32, #tpu.memory_space<vmem>> -> memref<8x128xf32, #tpu.memory_space<vmem>>
      tpu.wait_dma2 semaphore(%arg9 : memref<!tpu.dma_semaphore, #tpu.memory_space<semaphore_mem>>) src(%84 : memref<8x128xf32, #tpu.memory_space<vmem>>) dst(%86 : memref<8x128xf32, #tpu.memory_space<vmem>>)
    } else {
    }
    %c0_i32_39 = arith.constant 0 : i32
    %63 = arith.cmpi sgt, %54, %c0_i32_39 : i32
    %c1 = arith.constant 1 : index
    %c0_40 = arith.constant 0 : index
    %c0_41 = arith.constant 0 : index
    %64 = vector.load %arg7[%c1, %c0_40, %c0_41] : memref<2x8x128xf32, #tpu.memory_space<vmem>>, vector<1x8x128xf32>
    %65 = vector.shape_cast %64 : vector<1x8x128xf32> to vector<8x128xf32>
    %c1_42 = arith.constant 1 : index
    %c0_43 = arith.constant 0 : index
    %c0_44 = arith.constant 0 : index
    %66 = vector.load %arg6[%c1_42, %c0_43, %c0_44] : memref<2x16x128xf32, #tpu.memory_space<vmem>>, vector<1x8x128xf32>
    %67 = vector.shape_cast %66 : vector<1x8x128xf32> to vector<8x128xf32>
    %68 = arith.select %63, %65, %67 : vector<8x128xf32>
    %69 = tpu.iota {dimensions = array<i32: 0>} : vector<8x1xi32>
    %70 = vector.broadcast %52 : i32 to vector<8x1xi32>
    %71 = arith.cmpi slt, %69, %70 : vector<8x1xi32>
    %cst_45 = arith.constant 0.000000e+00 : f32
    %72 = vector.broadcast %cst_45 : f32 to vector<8x128xf32>
    %73 = vector.shape_cast %71 : vector<8x1xi1> to vector<8x1xi1>
    %74 = vector.broadcast %73 : vector<8x1xi1> to vector<8x128xi1>
    %75 = arith.select %74, %68, %72 : vector<8x128xi1>, vector<8x128xf32>
    %c1_46 = arith.constant 1 : index
    %c0_47 = arith.constant 0 : index
    %c0_48 = arith.constant 0 : index
    %76 = vector.load %arg5[%c1_46, %c0_47, %c0_48] : memref<2x8x128xf32, #tpu.memory_space<vmem>>, vector<1x8x128xf32>
    %77 = vector.shape_cast %76 : vector<1x8x128xf32> to vector<8x128xf32>
    %78 = vector.shape_cast %75 : vector<8x128xf32> to vector<1x8x128xf32>
    tpu.vector_store %arg5[%c1_46, %c0_47, %c0_48], %78 {strides = array<i32>} : memref<2x8x128xf32, #tpu.memory_space<vmem>>, vector<1x8x128xf32>,
    return
  }
  func.func @transform_1(%arg0: i32, %arg1: memref<2xi32, #tpu.memory_space<smem>>, %arg2: memref<2xi32, #tpu.memory_space<smem>>, %arg3: memref<2xi32, #tpu.memory_space<smem>>) -> (i32, i32, i32) {
    %c0_i32 = arith.constant 0 : i32
    %c0_i32_0 = arith.constant 0 : i32
    %c0_i32_1 = arith.constant 0 : i32
    return %arg0, %c0_i32, %c0_i32_0 : i32, i32, i32
  }
}

</mosaic_0001>

<bundles_post_ra>
// kernel: tpu_custom_call.1
= control target key start
LH: loop header
LB: loop body
LE: loop exit
PB: predicated region body
PF: predicated region fallthrough
CT: control target
= control target key end

     0   :  { %s374_s21 = smov [#allocation7]   ;;  %s375_s22 = smov [#allocation8]   ;;  %s445_s0 = inlined_call_operand.hbm [shape: s32[2], index: 0, kind: input, shape index: {}]   ;;  %s446_s3 = inlined_call_operand.hbm [shape: f32[8,128], index: 3, kind: input, shape index: {}]   ;;  %s447_s4 = inlined_call_operand.hbm [shape: f32[2,8,128], index: 4, kind: output, shape index: {}]   ;;  %s448_s1 = inlined_call_operand.hbm [shape: s32[2], index: 1, kind: input, shape index: {}]   ;;  %s449_s2 = inlined_call_operand.vmem [shape: s32[2], index: 2, kind: input, shape index: {}]  }
   0x1   :  { %s10_s17 = sshll.u32 %s445_s0, 4  ;;  %s15_s20 = sshll.u32 %s448_s1, 4  ;;  %s11_s17 = int_to_ptr.hbm [resolvable:$true] %s10_s17  ;;  %s16_s20 = int_to_ptr.hbm [resolvable:$true] %s15_s20 }
   0x2   :  { %13 = dma.hbm_to_smem %s11_s17, 16, %s374_s21, [#allocation6] }
   0x3   :  { %18 = dma.hbm_to_smem %s16_s20, 16, %s375_s22, [#allocation6] }
   0x4   :  { %s20_s25 = sshll.u32 %s449_s2, 4  ;;  %s376_s26 = smov [#allocation9]   ;;  %s21_s25 = int_to_ptr.vmem [resolvable:$true] %s20_s25 }
   0x5   :  { %23 = dma.vmem_to_smem %s21_s25, 16, %s376_s26, [#allocation6] }
   0x6   :  { %362 = dma.done.wait [#allocation6], 48 }
   0x7   :  { %363 = vsyncadd [#allocation6], 4294967248 }
   0x8   :  { %26 = sfence }
   0x9   :  { %27 = vsyncpa [#allocation11], 0  ;;  %s31_s0 = sld [smem:[#allocation8]]  ;;  %s377_s1 = smov [#allocation2]  }
   0xa   :  { %s237_s27 = sld [smem:[#allocation8 + $0x1]]  ;;  %s42_s28 = sshll.u32 %s377_s1, 4  ;;  %s43_s28 = int_to_ptr.vmem [resolvable:$true] %s42_s28 }
   0xb   :  { %s378_s29 = smov [#allocation2 + $0x10]   ;;  %s418_s5 = sld [smem:[#allocation7]] }
   0xc   :  { %s416_s30 = sshll.u32 %s378_s29, 4  ;;  %s420_s6 = sld [smem:[#allocation9]]  ;;  %s63_s30 = int_to_ptr.vmem [resolvable:$true] %s416_s30 }
   0xd   :  { %s294_s18 = scalar_lea.hbm %s446_s3, 8 }
   0xf   :  { %s32_s8 = scalar_lea.hbm %s446_s3, %s31_s0 }
  0x10   :  { %s40_s9 = sshll.u32 %s32_s8, 4  ;;  %s50_s12 = scalar_lea.hbm %s446_s3, %s237_s27  ;;  %s41_s9 = int_to_ptr.hbm [resolvable:$true] %s40_s9 }
  0x11   :  { %s60_s13 = sshll.u32 %s50_s12, 4  ;;  %s290_s14 = sshra.s32 %s41_s9, 4  ;;  %s291_s14 = int_to_ptr.hbm [resolvable:$true] %s290_s14  ;;  %s61_s13 = int_to_ptr.hbm [resolvable:$true] %s60_s13 }
  0x12   :  { %s292_s15 = scalar_lea.hbm %s291_s14, 8  ;;  %p295_p1 = scmp.lt.s32.totalorder %s291_s14, %s446_s3 }
  0x13   :  { %p293_p0 = scmp.ne.s32.totalorder %s291_s14, %s292_s15  ;;  %p296_p2 = scmp.lt.s32.totalorder %s294_s18, %s292_s15 }
  0x15   :  { %p297_p3 = por %p296_p2, %p295_p1 }
  0x17   :  { %p298_p4 = pnand %p297_p3, %p293_p0 }
  0x19   :  { %301 = shalt.err (!%p298_p4)  }
  0x1a   :  { %45 = dma.hbm_to_vmem [thread:$0]  %s41_s9, 128, %s43_s28, [#allocation4] }
  0x1b   :  { %s314_s21 = sshra.s32 %s61_s13, 4  ;;  %s315_s21 = int_to_ptr.hbm [resolvable:$true] %s314_s21 }
  0x1c   :  { %s316_s22 = scalar_lea.hbm %s315_s21, 8  ;;  %p319_p6 = scmp.lt.s32.totalorder %s315_s21, %s446_s3 }
  0x1d   :  { %p317_p5 = scmp.ne.s32.totalorder %s315_s21, %s316_s22  ;;  %p320_p7 = scmp.lt.s32.totalorder %s294_s18, %s316_s22 }
  0x1f   :  { %p321_p8 = por %p320_p7, %p319_p6 }
  0x21   :  { %p322_p9 = pnand %p321_p8, %p317_p5 }
  0x23   :  { %325 = shalt.err (!%p322_p9)  }
  0x24   :  { %65 = dma.hbm_to_vmem [thread:$0]  %s61_s13, 128, %s63_s30, [#allocation4 + $0x1] }
  0x25   :  { %364 = dma.done.wait [#allocation4], 128 }
  0x26   :  { %365 = vsyncadd [#allocation4], 4294967168  ;;  %p71_p10 = scmp.gt.s32.totalorder %s420_s6, 0  ;;  %p238_p11 = scmp.le.s32.totalorder %s420_s6, 0 }
  0x27   :  { %s75_s25 = scalar_lea.vmem (!%p238_p11), [#allocation2], %s420_s6 }
  0x28   :  { %74 = sbr.rel (%p238_p11) target bundleno = 50 (0x32), region = 13 }
  0x2d   :  { %v102_v0 = vld [vmem:[%s75_s25] sm:$0xff] }
  0x2e   :  { %103 = vst [vmem:[#allocation3] sm:$0xff] %v102_v0 }
  0x2f   :  { %109 = vsyncadd [#allocation5], 128 }
  0x30   :  { %366 = dma.done.wait [#allocation5], 128 }
  0x31   :  { %367 = vsyncadd [#allocation5], 4294967168 }
  0x32 PF:  { %s114_s3 = scalar_select %p71_p10, 1, 0  ;;  %v118_v1 = vlaneseq  ;;  %v113_v3 = vld [vmem:[#allocation2] sm:$0xff]  ;;  %v120_v4 = vstv %s418_s5 }
  0x33   :  { %s239_s26 = sld [smem:[#allocation7 + $0x1]] }
  0x34   :  { %v115_v5 = vstv %s114_s3  ;;  %v119_v6 = vshrl.u32 %v118_v1, 7  ;;  %s240_s0 = sld [smem:[#allocation9 + $0x1]] }
  0x35   :  { %v112_v2 = vld [vmem:[#allocation3] sm:$0xff]  ;;  %vm116_vm0 = vcmp.eq.s32.totalorder %v115_v5, 1 }
  0x36   :  { %v117_v7 = vsel %vm116_vm0, %v112_v2, %v113_v3  ;;  %vm121_vm1 = vcmp.lt.s32.totalorder %v119_v6, %v120_v4 }
  0x37   :  { %v124_v8 = vsel %vm121_vm1, %v117_v7, 0.0 }
  0x38   :  { %125 = vst [vmem:[#allocation10] sm:$0xff] %v124_v8 }
  0x39   :  { %368 = dma.done.wait [#allocation4 + $0x1], 128 }
  0x3a   :  { %369 = vsyncadd [#allocation4 + $0x1], 4294967168  ;;  %p130_p12 = scmp.gt.s32.totalorder %s240_s0, 0  ;;  %p241_p13 = scmp.le.s32.totalorder %s240_s0, 0 }
  0x3b   :  { %s227_s27 = scalar_lea.vmem (!%p241_p13), [#allocation2], %s240_s0 }
  0x3c   :  { %133 = sbr.rel (%p241_p13) target bundleno = 70 (0x46), region = 51 }
  0x41   :  { %v242_v9 = vld [vmem:[%s227_s27 + $0x10] sm:$0xff] }
  0x42   :  { %164 = vst [vmem:[#allocation3 + $0x8] sm:$0xff] %v242_v9 }
  0x43   :  { %170 = vsyncadd [#allocation5], 128 }
  0x44   :  { %370 = dma.done.wait [#allocation5], 128 }
  0x45   :  { %371 = vsyncadd [#allocation5], 4294967168 }
  0x46 PF:  { %s176_s1 = scalar_select %p130_p12, 1, 0  ;;  %v180_v10 = vstv %s239_s26  ;;  %v175_v12 = vld [vmem:[#allocation2 + $0x10] sm:$0xff] }
  0x47   :  { %s193_s30 = sshll.u32 %s447_s4, 4  ;;  %vm181_vm2 = vcmp.lt.s32.totalorder %v119_v6, %v180_v10  ;;  %s379_s5 = smov [#allocation10]   ;;  %s194_s30 = int_to_ptr.hbm [resolvable:$true] %s193_s30 }
  0x48   :  { %v177_v13 = vstv %s176_s1  ;;  %s191_s6 = sshll.u32 %s379_s5, 4  ;;  %s380_s2 = smov 128   ;;  %s192_s6 = int_to_ptr.vmem [resolvable:$true] %s191_s6 }
  0x49   :  { %v174_v11 = vld [vmem:[#allocation3 + $0x8] sm:$0xff]  ;;  %vm178_vm3 = vcmp.eq.s32.totalorder %v177_v13, 1  ;;  %s381_s7 = smov 8  }
  0x4a   :  { %v179_v14 = vsel %vm178_vm3, %v174_v11, %v175_v12 }
  0x4b   :  { %v184_v15 = vsel %vm181_vm2, %v179_v14, 0.0 }
  0x4c   :  { %186 = vst [vmem:[#allocation10 + $0x8] sm:$0xff] %v184_v15 }
  0x4d   :  { %199 = dma.vmem_to_hbm [thread:$0]  %s192_s6, 256, %s194_s30, [#allocation11], %s380_s2, %s380_s2, %s381_s7  }
  0x4e   :  { %372 = dma.done.wait [#allocation11], 256  }
  0x4f   :  { %373 = vsyncadd [#allocation11], 4294967040 }
  0x50   :  { %204 = vsyncpa [#allocation11], 1 }
  0x51   :  { %205 = vsyncmov [#allocation4] }
  0x54   :  { %s206_s8 = vpop.sfrf %205 }
  0x55   :  { %p243_p0 = scmp.ne.s32.totalorder %s206_s8, 0 }
  0x57   :  { %210 = shalt.err (%p243_p0)  }
  0x58   :  { %212 = vsyncmov [#allocation4 + $0x1] }
  0x5b   :  { %s213_s4 = vpop.sfrf %212 }
  0x5c   :  { %p244_p1 = scmp.ne.s32.totalorder %s213_s4, 0 }
  0x5e   :  { %217 = shalt.err (%p244_p1)  }
  0x5f   :  { %218 = vsyncmov [#allocation5] }
  0x62   :  { %s219_s9 = vpop.sfrf %218 }
  0x63   :  { %p245_p2 = scmp.ne.s32.totalorder %s219_s9, 0 }
  0x65   :  { %223 = shalt.err (%p245_p2)  }

</bundles_post_ra>
